<compile_context>
chip_gen: v6e
topology: v6e:2x2x1
jax: 0.10.0
libtpu: 0.0.40
codegen_flags: <defaults>
</compile_context>

<pallas_src>
from functools import partial

import jax
import jax.numpy as jnp
from jax.experimental import pallas as pl
from jax.experimental.pallas import tpu as pltpu

N = 50            # true problem size (matches Linear(50, ...))
NI = 128          # key / output axis padded to a full lane width (unmasked vld/vst)
NJ = 56           # softmax (query) axis padded to a sublane multiple only
H1, H2 = 128, 256
_FMIN = float(jnp.finfo(jnp.float32).min)


def _nw_kernel(key_ref, qry_ref, y_ref, wT_ref, out_ref, veff_ref, *, use_bf16_exp=False):
    # key_ref, qry_ref, y_ref, out_ref: (Bt, NI) lane-dense rows (one example per sublane row)
    # wT_ref : (NI, NI) zero-padded w_fold.T, VMEM-resident across grid steps
    # veff_ref: (Bt, NI) f32 scratch holding v_eff = y @ w_fold.T for the whole block
    bt = key_ref.shape[0]

    # Folded Linear chain applied to the whole batch block: one MXU matmul per grid step.
    veff_ref[...] = jnp.dot(y_ref[...], wT_ref[...], preferred_element_type=jnp.float32)

    # Hoisted constants (built once per grid step, closed over by the loop body).
    jj = jax.lax.broadcasted_iota(jnp.int32, (NJ, NI), 0)      # softmax index j (sublanes)
    ii = jax.lax.broadcasted_iota(jnp.int32, (NJ, NI), 1)      # output index i (lanes)
    eye = (jj == ii).astype(jnp.float32)                       # lane -> sublane mover
    valid_j = jj < N                                           # mask padded j rows

    def one_example(b, carry):
        krow = key_ref[pl.ds(b, 1), :]                         # (1, NI)  key[i] on lanes
        qrow = qry_ref[pl.ds(b, 1), :]                         # (1, NI)
        vrow = veff_ref[pl.ds(b, 1), :]                        # (1, NI)

        # Move query / v_eff from lanes to sublanes: mask + lane reduce (no reshape/relayout).
        q_col = jnp.sum(eye * qrow, axis=1, keepdims=True)     # (NJ, 1): q_col[j] = query[j]
        v_col = jnp.sum(eye * vrow, axis=1, keepdims=True)     # (NJ, 1): v_col[j] = v_eff[j]

        diff = krow - q_col                                    # (NJ, NI): key[i] - query[j]
        logits = -0.5 * diff * diff
        logits = jnp.where(valid_j, logits, _FMIN)             # kill padded j rows
        m = jnp.max(logits, axis=0, keepdims=True)             # (1, NI) per-column max (stable)
        z = logits - m
        if use_bf16_exp:                                       # v6e/v7x fast path; keep f32 on v5e
            e = jnp.exp(z.astype(jnp.bfloat16)).astype(jnp.float32)
        else:
            e = jnp.exp(z)
        denom = jnp.sum(e, axis=0, keepdims=True)              # (1, NI), >= 1 by construction
        num = jnp.sum(e * v_col, axis=0, keepdims=True)        # (1, NI)
        out_ref[pl.ds(b, 1), :] = num * pl.reciprocal(denom, approx=True)
        return carry

    jax.lax.fori_loop(0, bt, one_example, 0)


def _round_up(x, m):
    return (x + m - 1) // m * m


def fold_weights(w1, w2, w3):
    """Fold the bias-free Linear chain once.

    PyTorch layouts (out, in): w1 (128,50), w2 (256,128), w3 (50,256).
    res @ w1.T @ w2.T @ w3.T @ value == res @ w_fold @ value with w_fold = w1.T @ w2.T @ w3.T.
    """
    return (w1.T @ w2.T @ w3.T).astype(jnp.float32)            # (N, N)


@partial(jax.jit, static_argnames=("block_b", "use_bf16_exp"))
def nw_pool_adaptive_forward_batched(x_train, y_train, query, w_fold, *,
                                     block_b=None, use_bf16_exp=False):
    """x_train, y_train, query: (B, N) f32; w_fold: (N, N) from fold_weights."""
    B = x_train.shape[0]
    if block_b is None:
        # Prefer >=2 grid steps (v7x megacore) while capping per-step work at 256 examples.
        block_b = 8 if B <= 8 else min(256, _round_up((B + 1) // 2, 8))
    bt = max(8, _round_up(block_b, 8))
    b_pad = _round_up(B, bt)

    def pad(a):
        return jnp.pad(a.astype(jnp.float32), ((0, b_pad - B), (0, NI - N)))

    key = pad(x_train)
    qry = pad(query)
    yv = pad(y_train)
    w_t = jnp.pad(w_fold.T.astype(jnp.float32), ((0, NI - N), (0, NI - N)))

    out = pl.pallas_call(
        partial(_nw_kernel, use_bf16_exp=use_bf16_exp),
        out_shape=jax.ShapeDtypeStruct((b_pad, NI), jnp.float32),
        grid=(b_pad // bt,),
        in_specs=[
            pl.BlockSpec((bt, NI), lambda i: (i, 0)),
            pl.BlockSpec((bt, NI), lambda i: (i, 0)),
            pl.BlockSpec((bt, NI), lambda i: (i, 0)),
            pl.BlockSpec((NI, NI), lambda i: (0, 0)),   # w_fold.T: fetched once, stays resident
        ],
        out_specs=pl.BlockSpec((bt, NI), lambda i: (i, 0)),
        scratch_shapes=[pltpu.VMEM((bt, NI), jnp.float32)],
        compiler_params=pltpu.CompilerParams(dimension_semantics=("parallel",)),
    )(key, qry, yv, w_t)
    return out[:B, :N]


def nw_pool_adaptive_forward(x_train, y_train, query, w1=None, w2=None, w3=None, *,
                             w_fold=None, use_bf16_exp=False):
    """Single-example forward matching the PyTorch module interface."""
    if w_fold is None:
        w_fold = fold_weights(w1, w2, w3)
    out = nw_pool_adaptive_forward_batched(
        x_train[None], y_train[None], query[None], w_fold, use_bf16_exp=use_bf16_exp)
    return out[0]


def _reference(x_train, y_train, query, w1, w2, w3):
    diff = x_train[:, None] - query[None, :]
    res = jax.nn.softmax(-0.5 * diff * diff, axis=-1)
    h = res @ w1.T
    h = h @ w2.T
    h = h @ w3.T
    return h @ y_train


if __name__ == "__main__":
    root = jax.random.PRNGKey(0)
    k_x, k_noise, k_w1, k_w2, k_w3, k_bx, k_bn = jax.random.split(root, 7)

    # data generation mirroring the original script: y = 2*sin(x)^2 + x^0.8 + noise
    x_train = jnp.sort(jax.random.uniform(k_x, (N,), dtype=jnp.float32)) * 6.0
    noise = 0.4 * jax.random.normal(k_noise, (N,), dtype=jnp.float32)
    y_train = 2.0 * jnp.sin(x_train) ** 2 + x_train ** 0.8 + noise
    query = x_train

    # deterministic "Linear(bias=False)" weights, PyTorch layout (out_features, in_features)
    w1 = jax.random.normal(k_w1, (H1, N), jnp.float32) * (1.0 / jnp.sqrt(N))
    w2 = jax.random.normal(k_w2, (H2, H1), jnp.float32) * (1.0 / jnp.sqrt(H1))
    w3 = jax.random.normal(k_w3, (N, H2), jnp.float32) * (1.0 / jnp.sqrt(H2))
    w_fold = fold_weights(w1, w2, w3)   # folded once, out of the per-call path

    # --- single example (module-equivalent) ---
    out = jax.block_until_ready(
        nw_pool_adaptive_forward(x_train, y_train, query, w_fold=w_fold))
    ref = _reference(x_train, y_train, query, w1, w2, w3)
    assert out.shape == (N,)
    assert jnp.allclose(out, ref, atol=5e-3, rtol=5e-3), (out, ref)

    # --- batched path: multiple examples per grid step + >=2 parallel grid steps ---
    B = 40
    xb = jnp.sort(jax.random.uniform(k_bx, (B, N), dtype=jnp.float32), axis=-1) * 6.0
    yb = 2.0 * jnp.sin(xb) ** 2 + xb ** 0.8 + 0.4 * jax.random.normal(k_bn, (B, N), jnp.float32)
    qb = xb
    outb = jax.block_until_ready(nw_pool_adaptive_forward_batched(xb, yb, qb, w_fold))
    refb = jax.vmap(lambda x, y, q: _reference(x, y, q, w1, w2, w3))(xb, yb, qb)
    assert outb.shape == (B, N)
    assert jnp.allclose(outb, refb, atol=5e-3, rtol=5e-3), (outb, refb)

    # --- bf16-exp fast path (enable on v6e/v7x; keep f32 on v5e) ---
    outb16 = jax.block_until_ready(
        nw_pool_adaptive_forward_batched(xb, yb, qb, w_fold, use_bf16_exp=True))
    assert jnp.allclose(outb16, refb, atol=5e-2, rtol=5e-2), (outb16, refb)

    print("KERNEL_OK")
</pallas_src>

<mosaic_0001>
module attributes {stable_mosaic.version = 11 : i64} {
  func.func @_nw_kernel(%arg0: i32, %arg1: memref<8x128xf32, #tpu.memory_space<vmem>>, %arg2: memref<8x128xf32, #tpu.memory_space<vmem>>, %arg3: memref<8x128xf32, #tpu.memory_space<vmem>>, %arg4: memref<128x128xf32, #tpu.memory_space<vmem>>, %arg5: memref<8x128xf32, #tpu.memory_space<vmem>>, %arg6: memref<8x128xf32, #tpu.memory_space<vmem>>) attributes {dimension_semantics = [#tpu.dimension_semantics<parallel>], iteration_bounds = array<i64: 1>, scalar_prefetch = 0 : i64, scratch_operands = 1 : i64, tpu.core_type = #tpu.core_type<tc>, window_params = [{transform_indices = @transform_0, window_bounds = array<i64: 8, 128>}, {transform_indices = @transform_1, window_bounds = array<i64: 8, 128>}, {transform_indices = @transform_2, window_bounds = array<i64: 8, 128>}, {pipeline_mode = #tpu.pipeline_mode<synchronous>, transform_indices = @transform_3, window_bounds = array<i64: 128, 128>}, {transform_indices = @transform_4, window_bounds = array<i64: 8, 128>}]} {
    %c0 = arith.constant 0 : index
    %c0_0 = arith.constant 0 : index
    %0 = vector.load %arg3[%c0, %c0_0] : memref<8x128xf32, #tpu.memory_space<vmem>>, vector<8x128xf32>
    %c0_1 = arith.constant 0 : index
    %c0_2 = arith.constant 0 : index
    %1 = vector.load %arg4[%c0_1, %c0_2] : memref<128x128xf32, #tpu.memory_space<vmem>>, vector<128x128xf32>
    %cst = arith.constant dense<0.000000e+00> : vector<8x128xf32>
    %2 = tpu.matmul %0, %1, %cst {dimension_numbers = #tpu.dot_dimension_numbers<[1], [0], [0], [1], [0, 0, 1, 1], [], []>} : vector<8x128xf32>, vector<128x128xf32>, vector<8x128xf32> -> vector<8x128xf32>
    %c0_3 = arith.constant 0 : index
    %c0_4 = arith.constant 0 : index
    %3 = vector.load %arg6[%c0_3, %c0_4] : memref<8x128xf32, #tpu.memory_space<vmem>>, vector<8x128xf32>
    tpu.vector_store %arg6[%c0_3, %c0_4], %2 {strides = array<i32>} : memref<8x128xf32, #tpu.memory_space<vmem>>, vector<8x128xf32>,
    %4 = tpu.iota {dimensions = array<i32: 0>} : vector<56x128xi32>
    %5 = tpu.iota {dimensions = array<i32: 1>} : vector<56x128xi32>
    %6 = arith.cmpi eq, %4, %5 : vector<56x128xi32>
    %7 = arith.extui %6 : vector<56x128xi1> to vector<56x128xi32>
    %8 = arith.sitofp %7 : vector<56x128xi32> to vector<56x128xf32>
    %c50_i32 = arith.constant 50 : i32
    %9 = vector.broadcast %c50_i32 : i32 to vector<56x128xi32>
    %10 = arith.cmpi slt, %4, %9 : vector<56x128xi32>
    %c0_i32 = arith.constant 0 : i32
    %c8_i32 = arith.constant 8 : i32
    %11 = arith.addi %c0_i32, %c8_i32 : i32
    %c1_i32 = arith.constant 1 : i32
    scf.for %arg7 = %c0_i32 to %11 step %c1_i32  : i32 {
      %12 = arith.index_cast %arg7 : i32 to index
      %c0_6 = arith.constant 0 : index
      %13 = vector.load %arg1[%12, %c0_6] : memref<8x128xf32, #tpu.memory_space<vmem>>, vector<1x128xf32>
      %14 = arith.index_cast %arg7 : i32 to index
      %c0_7 = arith.constant 0 : index
      %15 = vector.load %arg2[%14, %c0_7] : memref<8x128xf32, #tpu.memory_space<vmem>>, vector<1x128xf32>
      %16 = arith.index_cast %arg7 : i32 to index
      %c0_8 = arith.constant 0 : index
      %17 = vector.load %arg6[%16, %c0_8] : memref<8x128xf32, #tpu.memory_space<vmem>>, vector<1x128xf32>
      %18 = vector.broadcast %15 : vector<1x128xf32> to vector<56x128xf32>
      %19 = arith.mulf %8, %18 : vector<56x128xf32>
      %cst_9 = arith.constant dense<0.000000e+00> : vector<56xf32>
      %20 = vector.multi_reduction <add>, %19, %cst_9 [1] : vector<56x128xf32> to vector<56xf32>
      %21 = vector.shape_cast %20 : vector<56xf32> to vector<56x1xf32>
      %22 = vector.broadcast %17 : vector<1x128xf32> to vector<56x128xf32>
      %23 = arith.mulf %8, %22 : vector<56x128xf32>
      %cst_10 = arith.constant dense<0.000000e+00> : vector<56xf32>
      %24 = vector.multi_reduction <add>, %23, %cst_10 [1] : vector<56x128xf32> to vector<56xf32>
      %25 = vector.shape_cast %24 : vector<56xf32> to vector<56x1xf32>
      %26 = vector.broadcast %13 : vector<1x128xf32> to vector<56x128xf32>
      %27 = vector.broadcast %21 : vector<56x1xf32> to vector<56x128xf32>
      %28 = arith.subf %26, %27 : vector<56x128xf32>
      %cst_11 = arith.constant -5.000000e-01 : f32
      %29 = vector.broadcast %cst_11 : f32 to vector<56x128xf32>
      %30 = arith.mulf %29, %28 : vector<56x128xf32>
      %31 = arith.mulf %30, %28 : vector<56x128xf32>
      %cst_12 = arith.constant -3.40282347E+38 : f32
      %32 = vector.broadcast %cst_12 : f32 to vector<56x128xf32>
      %33 = arith.select %10, %31, %32 : vector<56x128xi1>, vector<56x128xf32>
      %cst_13 = arith.constant dense<0xFF800000> : vector<128xf32>
      %34 = vector.multi_reduction <maximumf>, %33, %cst_13 [0] : vector<56x128xf32> to vector<128xf32>
      %35 = vector.shape_cast %34 : vector<128xf32> to vector<1x128xf32>
      %36 = vector.broadcast %35 : vector<1x128xf32> to vector<56x128xf32>
      %37 = arith.subf %33, %36 : vector<56x128xf32>
      %38 = math.exp %37 : vector<56x128xf32>
      %cst_14 = arith.constant dense<0.000000e+00> : vector<128xf32>
      %39 = vector.multi_reduction <add>, %38, %cst_14 [0] : vector<56x128xf32> to vector<128xf32>
      %40 = vector.shape_cast %39 : vector<128xf32> to vector<1x128xf32>
      %41 = vector.broadcast %25 : vector<56x1xf32> to vector<56x128xf32>
      %42 = arith.mulf %38, %41 : vector<56x128xf32>
      %cst_15 = arith.constant dense<0.000000e+00> : vector<128xf32>
      %43 = vector.multi_reduction <add>, %42, %cst_15 [0] : vector<56x128xf32> to vector<128xf32>
      %44 = vector.shape_cast %43 : vector<128xf32> to vector<1x128xf32>
      %45 = tpu.reciprocal %40 {approx = true} : vector<1x128xf32> -> vector<1x128xf32>
      %46 = arith.mulf %44, %45 : vector<1x128xf32>
      %47 = arith.index_cast %arg7 : i32 to index
      %c0_16 = arith.constant 0 : index
      %48 = vector.load %arg5[%47, %c0_16] : memref<8x128xf32, #tpu.memory_space<vmem>>, vector<1x128xf32>
      tpu.vector_store %arg5[%47, %c0_16], %46 {strides = array<i32>} : memref<8x128xf32, #tpu.memory_space<vmem>>, vector<1x128xf32>,
    }
    %c8_i32_5 = arith.constant 8 : i32
    return
  }
  func.func @transform_0(%arg0: i32) -> (i32, i32) {
    %c0_i32 = arith.constant 0 : i32
    %c0_i32_0 = arith.constant 0 : i32
    return %arg0, %c0_i32 : i32, i32
  }
  func.func @transform_1(%arg0: i32) -> (i32, i32) {
    %c0_i32 = arith.constant 0 : i32
    %c0_i32_0 = arith.constant 0 : i32
    return %arg0, %c0_i32 : i32, i32
  }
  func.func @transform_2(%arg0: i32) -> (i32, i32) {
    %c0_i32 = arith.constant 0 : i32
    %c0_i32_0 = arith.constant 0 : i32
    return %arg0, %c0_i32 : i32, i32
  }
  func.func @transform_3(%arg0: i32) -> (i32, i32) {
    %c0_i32 = arith.constant 0 : i32
    %c0_i32_0 = arith.constant 0 : i32
    %c0_i32_1 = arith.constant 0 : i32
    return %c0_i32, %c0_i32_0 : i32, i32
  }
  func.func @transform_4(%arg0: i32) -> (i32, i32) {
    %c0_i32 = arith.constant 0 : i32
    %c0_i32_0 = arith.constant 0 : i32
    return %arg0, %c0_i32 : i32, i32
  }
}

</mosaic_0001>

<bundles_post_ra>
// kernel: nw_pool_adaptive_forward_batched.1
= control target key start
LH: loop header
LB: loop body
LE: loop exit
PB: predicated region body
PF: predicated region fallthrough
CT: control target
= control target key end

     0   :  { %v105_v0 = vlaneseq  ;;  %v414_v1 = vmov 0.0   ;;  %vm415_vm0 = vmmov 0   ;;  %s534_s23 = smov 0   ;;  %s571_s0 = inlined_call_operand.vmem [shape: f32[8,128], index: 0, kind: input, shape index: {}]   ;;  %s572_s1 = inlined_call_operand.vmem [shape: f32[8,128], index: 1, kind: input, shape index: {}]   ;;  %s573_s4 = inlined_call_operand.vmem [shape: f32[8,128], index: 4, kind: output, shape index: {}]   ;;  %s574_s3 = inlined_call_operand.vmem [shape: f32[128,128], index: 3, kind: input, shape index: {}]   ;;  %s575_s2 = inlined_call_operand.vmem [shape: f32[8,128], index: 2, kind: input, shape index: {}]  }
   0x1   :  { %345 = vmatprep.subr.mxu0 %v414_v1  ;;  %v33_v2 = vld [vmem:[%s574_s3 + $0x78] sm:$0xff]  ;;  %v32_v3 = vld [vmem:[%s574_s3 + $0x70] sm:$0xff]  ;;  %377 = vmatprep.mubr.msk.f32.mxu0 %vm415_vm0, %v414_v1  ;;  %v31_v6 = vld [vmem:[%s574_s3 + $0x68] sm:$0xff] }
   0x2   :  { %v106_v4 = vshrl.u32 %v105_v0, 7  ;;  %v114_v5 = vand.u32 127, %v105_v0  ;;  %346 = vmatpush3.msra.mxu0 %v33_v2  ;;  %v30_v13 = vld [vmem:[%s574_s3 + $0x60] sm:$0xff]  ;;  %v29_v16 = vld [vmem:[%s574_s3 + $0x58] sm:$0xff]  ;;  %v28_v22 = vld [vmem:[%s574_s3 + $0x50] sm:$0xff] }
   0x3   :  { %347 = vmatprep.subr.mxu0 %v414_v1  ;;  %v27_v23 = vld [vmem:[%s574_s3 + $0x48] sm:$0xff]  ;;  %v26_v24 = vld [vmem:[%s574_s3 + $0x40] sm:$0xff]  ;;  %v25_v25 = vld [vmem:[%s574_s3 + $0x38] sm:$0xff] }
   0x4   :  { %v107_v7 = vadd.s32 8, %v106_v4  ;;  %v108_v8 = vadd.s32 16, %v106_v4  ;;  %v109_v9 = vadd.s32 24, %v106_v4  ;;  %v110_v10 = vadd.s32 32, %v106_v4  ;;  %348 = vmatpush3.msra.mxu0 %v32_v3  ;;  %v24_v26 = vld [vmem:[%s574_s3 + $0x30] sm:$0xff]  ;;  %v23_v27 = vld [vmem:[%s574_s3 + $0x28] sm:$0xff] }
   0x5   :  { %v111_v11 = vadd.s32 40, %v106_v4  ;;  %v453_v12 = vadd.s32 48, %v106_v4  ;;  %vm115_vm1 = vcmp.eq.s32.totalorder %v106_v4, %v114_v5  ;;  %349 = vmatprep.subr.mxu0 %v414_v1  ;;  %v22_v28 = vld [vmem:[%s574_s3 + $0x20] sm:$0xff]  ;;  %v21_v29 = vld [vmem:[%s574_s3 + $0x18] sm:$0xff]  ;;  %v20_v30 = vld [vmem:[%s574_s3 + $0x10] sm:$0xff] }
   0x6   :  { %vm116_vm2 = vcmp.eq.s32.totalorder %v107_v7, %v114_v5  ;;  %vm117_vm3 = vcmp.eq.s32.totalorder %v108_v8, %v114_v5  ;;  %vm118_vm4 = vcmp.eq.s32.totalorder %v109_v9, %v114_v5  ;;  %vm119_vm5 = vcmp.eq.s32.totalorder %v110_v10, %v114_v5  ;;  %350 = vmatpush3.msra.mxu0 %v31_v6  ;;  %v19_v31 = vld [vmem:[%s574_s3 + $0x8] sm:$0xff]  ;;  %v18_v32 = vld [vmem:[%s574_s3] sm:$0xff] }
   0x7   :  { %vm120_vm6 = vcmp.eq.s32.totalorder %v111_v11, %v114_v5  ;;  %vm121_vm7 = vcmp.eq.s32.totalorder %v453_v12, %v114_v5  ;;  %v461_v14 = vsel %vm115_vm1, 1.0, %v414_v1  ;;  %v464_v15 = vsel %vm116_vm2, 1.0, %v414_v1  ;;  %351 = vmatprep.subr.mxu0 %v414_v1  ;;  %v17_v33 = vld [vmem:[%s575_s2] sm:$0xff] }
   0x8   :  { %v471_v17 = vsel %vm117_vm3, 1.0, %v414_v1  ;;  %v474_v18 = vsel %vm118_vm4, 1.0, %v414_v1  ;;  %v477_v19 = vsel %vm119_vm5, 1.0, %v414_v1  ;;  %v480_v20 = vsel %vm120_vm6, 1.0, %v414_v1  ;;  %352 = vmatpush3.msra.mxu0 %v30_v13 }
   0x9   :  { %v483_v21 = vsel %vm121_vm7, 1.0, %v414_v1  ;;  %vm142_vm8 = vcmp.lt.s32.totalorder %v453_v12, 50  ;;  %353 = vmatprep.subr.mxu0 %v414_v1 }
   0xa   :  { %354 = vmatpush3.msra.mxu0 %v29_v16 }
   0xb   :  { %355 = vmatprep.subr.mxu0 %v414_v1 }
   0xc   :  { %356 = vmatpush3.msra.mxu0 %v28_v22 }
   0xd   :  { %357 = vmatprep.subr.mxu0 %v414_v1 }
   0xe   :  { %358 = vmatpush3.msra.mxu0 %v27_v23 }
   0xf   :  { %359 = vmatprep.subr.mxu0 %v414_v1 }
  0x10   :  { %360 = vmatpush3.msra.mxu0 %v26_v24 }
  0x11   :  { %361 = vmatprep.subr.mxu0 %v414_v1 }
  0x12   :  { %362 = vmatpush3.msra.mxu0 %v25_v25 }
  0x13   :  { %363 = vmatprep.subr.mxu0 %v414_v1 }
  0x14   :  { %364 = vmatpush3.msra.mxu0 %v24_v26 }
  0x15   :  { %365 = vmatprep.subr.mxu0 %v414_v1 }
  0x16   :  { %366 = vmatpush3.msra.mxu0 %v23_v27 }
  0x17   :  { %367 = vmatprep.subr.mxu0 %v414_v1 }
  0x18   :  { %368 = vmatpush3.msra.mxu0 %v22_v28 }
  0x19   :  { %369 = vmatprep.subr.mxu0 %v414_v1 }
  0x1a   :  { %370 = vmatpush3.msra.mxu0 %v21_v29 }
  0x1b   :  { %371 = vmatprep.subr.mxu0 %v414_v1 }
  0x1c   :  { %372 = vmatpush3.msra.mxu0 %v20_v30 }
  0x1d   :  { %373 = vmatprep.subr.mxu0 %v414_v1 }
  0x1e   :  { %374 = vmatpush3.msra.mxu0 %v19_v31 }
  0x1f   :  { %375 = vmatprep.subr.mxu0 %v414_v1 }
  0x20   :  { %376 = vmatpush3.msra.mxu0 %v18_v32 }
  0x21   :  { %378 = vmatmul.mubr.f32.vlgmr.msra.gmra.mxu0 %v17_v33 }
  0xe1   :  { %v100_v34 = vpop.f32.mrf.mxu0 }
  0xe2   :  { %104 = vst [vmem:[#allocation2] sm:$0xff] %v100_v34 }
  0xe3   :  { %v379_v35 = vpop.f32.mrf.mxu0 }
  0xe4 LB: > { %s151_s2 = scalar_lea.vmem %s572_s1, %s412_s23  ;;  %s153_s25 = scalar_lea.vmem [#allocation2], %s412_s23  ;;  %s412_s23 = sphi %s534_s23, %s148_s23  }
  0xe5   : > { %v325_v36 = vld [vmem:[%s151_s2] ss:$0 sm:$0xff]  ;;  %s149_s28 = scalar_lea.vmem %s571_s0, %s412_s23  ;;  %s303_s5 = scalar_lea.vmem %s573_s4, %s412_s23 }
  0xe6   : > { %v165_v37 = vmul.f32 %v325_v36, %v483_v21  ;;  %v160_v38 = vmul.f32 %v325_v36, %v464_v15  ;;  %v161_v39 = vmul.f32 %v325_v36, %v471_v17  ;;  %v159_v40 = vmul.f32 %v325_v36, %v461_v14  ;;  %v327_v54 = vld [vmem:[%s149_s28] ss:$0 sm:$0xff]  ;;  %s148_s23 = sadd.s32 1, %s412_s23  }
  0xe7   : > { %v164_v41 = vmul.f32 %v325_v36, %v480_v20  ;;  %v163_v42 = vmul.f32 %v325_v36, %v477_v19  ;;  %v162_v44 = vmul.f32 %v325_v36, %v474_v18  ;;  %p145_p0 = scmp.ge.s32.totalorder %s148_s23, 8  }
  0xe8   : > { %178 = vadd.xlane.f32.xlu0 %v165_v37  ;;  %168 = vadd.xlane.f32.xlu1 %v160_v38 }
  0xe9   : > { %v326_v43 = vld [vmem:[%s153_s25] ss:$0 sm:$0xff] }
  0xea   : > { %v184_v45 = vmul.f32 %v326_v43, %v461_v14  ;;  %v186_v46 = vmul.f32 %v326_v43, %v471_v17  ;;  %v185_v47 = vmul.f32 %v326_v43, %v464_v15  ;;  %v188_v48 = vmul.f32 %v326_v43, %v477_v19 }
  0xeb   : > { %v187_v49 = vmul.f32 %v326_v43, %v474_v18  ;;  %v190_v50 = vmul.f32 %v326_v43, %v483_v21  ;;  %v189_v51 = vmul.f32 %v326_v43, %v480_v20 }
  0xec   : > { %170 = vadd.xlane.f32.xlu1 %v161_v39  ;;  %166 = vadd.xlane.f32.xlu0 %v159_v40 }
  0xf0   : > { %176 = vadd.xlane.f32.xlu1 %v164_v41  ;;  %174 = vadd.xlane.f32.xlu0 %v163_v42 }
  0xf4   : > { %172 = vadd.xlane.f32.xlu0 %v162_v44  ;;  %191 = vadd.xlane.f32.xlu1 %v184_v45 }
  0xf8   : > { %195 = vadd.xlane.f32.xlu1 %v186_v46  ;;  %193 = vadd.xlane.f32.xlu0 %v185_v47 }
  0xfc   : > { %199 = vadd.xlane.f32.xlu1 %v188_v48  ;;  %197 = vadd.xlane.f32.xlu0 %v187_v49 }
 0x100   : > { %203 = vadd.xlane.f32.xlu1 %v190_v50  ;;  %201 = vadd.xlane.f32.xlu0 %v189_v51 }
 0x171   : > { %v179_v52 = vpop.xlane.xlu0 %178  ;;  %v169_v53 = vpop.xlane.xlu1 %168 }
 0x172   : > { %v215_v55 = vsub.f32 %v327_v54, %v179_v52  ;;  %v210_v56 = vsub.f32 %v327_v54, %v169_v53 }
 0x174   : > { %v222_v61 = vmul.f32 -0.5, %v215_v55  ;;  %v217_v62 = vmul.f32 -0.5, %v210_v56 }
 0x175   : > { %v171_v57 = vpop.xlane.xlu1 %170  ;;  %v167_v58 = vpop.xlane.xlu0 %166 }
 0x176   : > { %v211_v59 = vsub.f32 %v327_v54, %v171_v57  ;;  %v209_v60 = vsub.f32 %v327_v54, %v167_v58  ;;  %v229_v7 = vmul.f32 %v222_v61, %v215_v55  ;;  %v224_v8 = vmul.f32 %v217_v62, %v210_v56 }
 0x178   : > { %v218_v63 = vmul.f32 -0.5, %v211_v59  ;;  %v216_v2 = vmul.f32 -0.5, %v209_v60  ;;  %v236_v26 = vsel %vm142_vm8, %v229_v7, -3.4028235e+38 }
 0x179   : > { %v177_v0 = vpop.xlane.xlu1 %176  ;;  %v175_v1 = vpop.xlane.xlu0 %174 }
 0x17a   : > { %v214_v3 = vsub.f32 %v327_v54, %v177_v0  ;;  %v213_v4 = vsub.f32 %v327_v54, %v175_v1  ;;  %v225_v9 = vmul.f32 %v218_v63, %v211_v59  ;;  %v223_v11 = vmul.f32 %v216_v2, %v209_v60 }
 0x17c   : > { %v221_v5 = vmul.f32 -0.5, %v214_v3  ;;  %v220_v6 = vmul.f32 -0.5, %v213_v4  ;;  %v239_v27 = vmax.f32 %v225_v9, %v236_v26 }
 0x17d   : > { %v173_v10 = vpop.xlane.xlu0 %172  ;;  %v192_v51 = vpop.xlane.xlu1 %191 }
 0x17e   : > { %v228_v13 = vmul.f32 %v221_v5, %v214_v3  ;;  %v227_v16 = vmul.f32 %v220_v6, %v213_v4  ;;  %v212_v22 = vsub.f32 %v327_v54, %v173_v10 }
 0x180   : > { %v238_v23 = vmax.f32 %v224_v8, %v228_v13  ;;  %v237_v24 = vmax.f32 %v223_v11, %v227_v16  ;;  %v219_v25 = vmul.f32 -0.5, %v212_v22 }
 0x181   : > { %v194_v53 = vpop.xlane.xlu0 %193  ;;  %v196_v54 = vpop.xlane.xlu1 %195 }
 0x182   : > { %v226_v28 = vmul.f32 %v219_v25, %v212_v22  ;;  %v240_v29 = vmax.f32 %v237_v24, %v238_v23 }
 0x184   : > { %v241_v30 = vmax.f32 %v239_v27, %v226_v28 }
 0x185   : > { %v198_v59 = vpop.xlane.xlu0 %197  ;;  %v200_v63 = vpop.xlane.xlu1 %199 }
 0x186   : > { %v242_v31 = vmax.f32 %v240_v29, %v241_v30 }
 0x188   : > { %v243_v32 = vrot.slane %v242_v31, 4 }
 0x18a   : > { %v244_v33 = vmax.f32 %v242_v31, %v243_v32 }
 0x18c   : > { %v245_v34 = vrot.slane %v244_v33, 2 }
 0x18e   : > { %v246_v35 = vmax.f32 %v244_v33, %v245_v34 }
 0x190   : > { %v247_v36 = vrot.slane %v246_v35, 1 }
 0x192   : > { %v248_v37 = vmax.f32 %v246_v35, %v247_v36 }
 0x194   : > { %v249_v38 = vsub.f32 %v223_v11, %v248_v37  ;;  %v251_v39 = vsub.f32 %v225_v9, %v248_v37  ;;  %v250_v40 = vsub.f32 %v224_v8, %v248_v37  ;;  %v252_v41 = vsub.f32 %v226_v28, %v248_v37  ;;  %v202_v8 = vpop.xlane.xlu0 %201 }
 0x195   : > { %v253_v45 = vsub.f32 %v227_v16, %v248_v37  ;;  %v254_v47 = vsub.f32 %v228_v13, %v248_v37  ;;  %v255_v49 = vsub.f32 %v236_v26, %v248_v37  ;;  %v204_v16 = vpop.xlane.xlu1 %203 }
 0x196   : > { %v256_v42 = vmul.f32 1.442695, %v249_v38  ;;  %v260_v43 = vmul.f32 1.442695, %v251_v39  ;;  %v258_v44 = vmul.f32 1.442695, %v250_v40 }
 0x197   : > { %v262_v46 = vmul.f32 1.442695, %v252_v41  ;;  %v264_v48 = vmul.f32 1.442695, %v253_v45  ;;  %v266_v50 = vmul.f32 1.442695, %v254_v47 }
 0x198   : > { %390 = vpow2.f32 %v256_v42  ;;  %v268_v52 = vmul.f32 1.442695, %v255_v49 }
 0x199   : > { %392 = vpow2.f32 %v260_v43 }
 0x19a   : > { %394 = vpow2.f32 %v258_v44 }
 0x19b   : > { %396 = vpow2.f32 %v262_v46 }
 0x19c   : > { %398 = vpow2.f32 %v264_v48 }
 0x19d   : > { %400 = vpow2.f32 %v266_v50 }
 0x19e   : > { %402 = vpow2.f32 %v268_v52 }
 0x1a5   : > { %v391_v55 = vpop.eup %390 }
 0x1a6   : > { %v393_v56 = vpop.eup %392  ;;  %v282_v57 = vmul.f32 %v391_v55, %v192_v51 }
 0x1a7   : > { %v395_v58 = vpop.eup %394  ;;  %v284_v0 = vmul.f32 %v393_v56, %v196_v54 }
 0x1a8   : > { %v270_v60 = vadd.f32 %v395_v58, %v391_v55  ;;  %v283_v61 = vmul.f32 %v395_v58, %v194_v53  ;;  %v397_v62 = vpop.eup %396 }
 0x1a9   : > { %v399_v3 = vpop.eup %398  ;;  %v285_v5 = vmul.f32 %v397_v62, %v198_v59 }
 0x1aa   : > { %v271_v1 = vadd.f32 %v393_v56, %v270_v60  ;;  %v289_v2 = vadd.f32 %v283_v61, %v282_v57  ;;  %v401_v7 = vpop.eup %400  ;;  %v286_v10 = vmul.f32 %v399_v3, %v200_v63 }
 0x1ab   : > { %v403_v13 = vpop.eup %402  ;;  %v287_v23 = vmul.f32 %v401_v7, %v202_v8 }
 0x1ac   : > { %v272_v4 = vadd.f32 %v397_v62, %v271_v1  ;;  %v290_v6 = vadd.f32 %v289_v2, %v284_v0  ;;  %v288_v25 = vmul.f32 %v403_v13, %v204_v16 }
 0x1ae   : > { %v273_v9 = vadd.f32 %v399_v3, %v272_v4  ;;  %v291_v11 = vadd.f32 %v290_v6, %v285_v5 }
 0x1b0   : > { %v274_v22 = vadd.f32 %v401_v7, %v273_v9  ;;  %v292_v24 = vadd.f32 %v291_v11, %v286_v10 }
 0x1b2   : > { %v275_v26 = vadd.f32 %v403_v13, %v274_v22  ;;  %v293_v27 = vadd.f32 %v292_v24, %v287_v23 }
 0x1b4   : > { %v276_v28 = vrot.slane %v275_v26, 4  ;;  %v294_v29 = vadd.f32 %v293_v27, %v288_v25 }
 0x1b6   : > { %v277_v30 = vadd.f32 %v276_v28, %v275_v26  ;;  %v295_v32 = vrot.slane %v294_v29, 4 }
 0x1b8   : > { %v278_v31 = vrot.slane %v277_v30, 2  ;;  %v296_v35 = vadd.f32 %v295_v32, %v294_v29 }
 0x1ba   : > { %v279_v33 = vadd.f32 %v278_v31, %v277_v30  ;;  %v297_v37 = vrot.slane %v296_v35, 2 }
 0x1bc   : > { %v280_v34 = vrot.slane %v279_v33, 1  ;;  %v298_v38 = vadd.f32 %v297_v37, %v296_v35 }
 0x1be   : > { %v281_v36 = vadd.f32 %v280_v34, %v279_v33  ;;  %v299_v39 = vrot.slane %v298_v38, 1 }
 0x1c0   : > { %404 = vrcp.f32 %v281_v36  ;;  %v300_v40 = vadd.f32 %v299_v39, %v298_v38 }
 0x1cc   :  { %147 = sbr.rel (!%p145_p0) target bundleno = 228 (0xe4), region = 47 }
 0x1cd   : > { %v405_v41 = vpop.eup %404 }
 0x1ce   : > { %v302_v42 = vmul.f32 %v405_v41, %v300_v40 }
 0x1d0   : > { %304 = vst [vmem:[%s303_s5] sm:$0x1] %v302_v42 }

</bundles_post_ra>
